<compile_context>
chip_gen: v7x
topology: tpu7x:2x2x1
jax: 0.10.0
libtpu: 0.0.40
codegen_flags: <defaults>
</compile_context>

<pallas_src>
import functools

import jax
import jax.numpy as jnp
from jax.experimental import pallas as pl
from jax.experimental.pallas import tpu as pltpu


def _round_up(x, m):
    return (x + m - 1) // m * m


def _vmem_capacity_bytes():
    """Physical VMEM of the attached chip; conservative fallback if unknown."""
    try:
        return int(pltpu.get_tpu_info().vmem_capacity_bytes)
    except Exception:
        return 64 << 20  # v7x-sized fallback: safe everywhere


def _pick_block_n(n, d, itemsize, vmem_bytes):
    """Node-axis tile size.

    Per grid step the working set is the double-buffered input tile plus the
    in-body f32 upcast temporaries (~2 f32 copies of the tile).  Keep that
    under ~1/3 of physical VMEM so output/scratch/pipeline state fit too.
    """
    budget = vmem_bytes // 3
    per_row = d * (2 * itemsize + 2 * 4)
    rows = budget // max(per_row, 1)
    if rows >= n:
        return n                      # single tile == full array dims
    return max(8, (rows // 8) * 8)


def _fixed_context_kernel(idx_ref, x_ref, out_ref, acc_ref, *, n, d, tn, p):
    # idx_ref : SMEM (2,) int32  -> [current_idx, end_idx] (scalar prefetch)
    # x_ref   : VMEM (tn, d)     -> tile of final node embeddings
    # out_ref : VMEM (1, p)      -> lane-dense context row, p = round_up(3d, 128)
    # acc_ref : VMEM (3, d) f32  -> rows: [node-sum, current_row, end_row]
    t = pl.program_id(0)
    n_tiles = pl.num_programs(0)

    @pl.when(t == 0)
    def _():
        acc_ref[...] = jnp.zeros_like(acc_ref)

    # --- node-axis partial sum, accumulated in float32 -----------------------
    # Ragged mask only on the (statically known) ragged last tile; the hot
    # path is a pure upcast + sublane sum, fully hidden under the input DMA.
    if n % tn == 0:
        acc_ref[0, :] += jnp.sum(x_ref[...].astype(jnp.float32), axis=0)
    else:
        @pl.when(t != n_tiles - 1)
        def _():
            acc_ref[0, :] += jnp.sum(x_ref[...].astype(jnp.float32), axis=0)

        @pl.when(t == n_tiles - 1)
        def _():
            x = x_ref[...].astype(jnp.float32)
            row = t * tn + jax.lax.broadcasted_iota(jnp.int32, (tn, d), 0)
            acc_ref[0, :] += jnp.sum(jnp.where(row < n, x, 0.0), axis=0)

    # --- gather current / end rows from whichever resident tile holds them ---
    # Clamp in-kernel (scalar ALU, free); OOB dynamic VMEM reads are unchecked.
    start = t * tn
    cur = jnp.clip(idx_ref[0], 0, n - 1)
    end = jnp.clip(idx_ref[1], 0, n - 1)

    @pl.when(jnp.logical_and(cur >= start, cur < start + tn))
    def _():
        acc_ref[1, :] = x_ref[cur - start, :].astype(jnp.float32)

    @pl.when(jnp.logical_and(end >= start, end < start + tn))
    def _():
        acc_ref[2, :] = x_ref[end - start, :].astype(jnp.float32)

    # --- single end-of-grid output write: [mean | cur | end | 0-pad] ---------
    @pl.when(t == n_tiles - 1)
    def _():
        inv_n = jnp.float32(1.0 / n)
        out_ref[0, pl.ds(0, d)] = (acc_ref[0, :] * inv_n).astype(out_ref.dtype)
        out_ref[0, pl.ds(d, d)] = acc_ref[1, :].astype(out_ref.dtype)
        out_ref[0, pl.ds(2 * d, d)] = acc_ref[2, :].astype(out_ref.dtype)
        if p > 3 * d:
            out_ref[0, pl.ds(3 * d, p - 3 * d)] = jnp.zeros(
                (p - 3 * d,), out_ref.dtype)


def fixed_context(final_node_embeddings, current_idx, end_idx):
    """Pallas implementation of FixedContext.forward.

    final_node_embeddings: (N, D) float array
    current_idx, end_idx : int scalars (python int or 0-d int array)
    returns              : (3*D,) context vector

    Note: out-of-range indices are clamped to [0, N) instead of raising.
    """
    n, d = final_node_embeddings.shape
    vmem_bytes = _vmem_capacity_bytes()
    itemsize = final_node_embeddings.dtype.itemsize
    tn = _pick_block_n(n, d, itemsize, vmem_bytes)
    p = _round_up(3 * d, 128)
    n_tiles = pl.cdiv(n, tn)

    # Raise the scoped VMEM limit only when the per-step working set would
    # exceed the smallest default scoped limit (16 MiB on v5e); cap well under
    # physical VMEM (64 MiB on v7x, 128 MiB on v5e/v6e).
    working_set = tn * d * (2 * itemsize + 2 * 4) + (1 << 20)
    vmem_limit = None
    if working_set > (16 << 20):
        vmem_limit = min(int(working_set * 3 // 2), (vmem_bytes * 3) // 4)

    idx = jnp.stack([jnp.asarray(current_idx, dtype=jnp.int32),
                     jnp.asarray(end_idx, dtype=jnp.int32)])

    kernel = functools.partial(_fixed_context_kernel, n=n, d=d, tn=tn, p=p)

    out = pl.pallas_call(
        kernel,
        out_shape=jax.ShapeDtypeStruct((1, p), final_node_embeddings.dtype),
        grid_spec=pltpu.PrefetchScalarGridSpec(
            num_scalar_prefetch=1,
            grid=(n_tiles,),
            in_specs=[pl.BlockSpec((tn, d), lambda t, idx_ref: (t, 0))],
            out_specs=pl.BlockSpec((1, p), lambda t, idx_ref: (0, 0)),
            scratch_shapes=[pltpu.VMEM((3, d), jnp.float32)],
        ),
        compiler_params=pltpu.CompilerParams(
            dimension_semantics=("arbitrary",),   # node axis is a reduction
            vmem_limit_bytes=vmem_limit,
        ),
    )(idx, final_node_embeddings)

    # TODO(synk): let the consumer take the (1, P) lane-dense row directly and
    # fold this slice into the consuming op.
    return out[0, :3 * d]


def _reference(final_node_embeddings, current_idx, end_idx):
    graph = jnp.mean(final_node_embeddings, axis=0)
    cur = final_node_embeddings[current_idx, :]
    end = final_node_embeddings[end_idx, :]
    return jnp.concatenate([graph, cur, end], axis=-1)


if __name__ == "__main__":
    key = jax.random.PRNGKey(0)
    N, D = 8, 32  # num_nodes, embed_dim

    k_x, k_w, k_b = jax.random.split(key, 3)
    final_node_embeddings = jax.random.normal(k_x, (N, D), dtype=jnp.float32)

    # project_context Linear params: created in the module's __init__ but never
    # applied in forward; kept only for shape/parity.
    project_context_w = jax.random.normal(k_w, (D, 3 * D), dtype=jnp.float32) * 0.02
    project_context_b = jax.random.normal(k_b, (D,), dtype=jnp.float32) * 0.02

    current_idx = 2
    end_idx = 5

    out = fixed_context(final_node_embeddings, current_idx, end_idx)
    out = jax.block_until_ready(out)

    ref = _reference(final_node_embeddings, current_idx, end_idx)
    assert out.shape == (3 * D,), out.shape
    assert jnp.allclose(out, ref, atol=1e-5, rtol=1e-5), "mismatch vs reference"

    print("KERNEL_OK")
</pallas_src>

<mosaic_0001>
module attributes {stable_mosaic.version = 11 : i64} {
  func.func @_fixed_context_kernel(%arg0: i32, %arg1: memref<2xi32, #tpu.memory_space<smem>>, %arg2: memref<8x32xf32, #tpu.memory_space<vmem>>, %arg3: memref<1x128xf32, #tpu.memory_space<vmem>>, %arg4: memref<3x32xf32, #tpu.memory_space<vmem>>) attributes {dimension_semantics = [#tpu.dimension_semantics<arbitrary>], iteration_bounds = array<i64: 1>, scalar_prefetch = 1 : i64, scratch_operands = 1 : i64, tpu.core_type = #tpu.core_type<tc>, window_params = [{transform_indices = @transform_0, window_bounds = array<i64: 8, 32>}, {pipeline_mode = #tpu.pipeline_mode<synchronous>, transform_indices = @transform_1, window_bounds = array<i64: 1, 128>}]} {
    %c0_i32 = arith.constant 0 : i32
    %0 = arith.cmpi eq, %arg0, %c0_i32 : i32
    %1 = arith.extui %0 : i1 to i32
    %c0_i32_0 = arith.constant 0 : i32
    %2 = arith.cmpi ne, %1, %c0_i32_0 : i32
    scf.if %2 {
      %cst_16 = arith.constant 0.000000e+00 : f32
      %33 = vector.broadcast %cst_16 : f32 to vector<3x32xf32>
      %c0_17 = arith.constant 0 : index
      %c0_18 = arith.constant 0 : index
      %34 = vector.load %arg4[%c0_17, %c0_18] : memref<3x32xf32, #tpu.memory_space<vmem>>, vector<3x32xf32>
      tpu.vector_store %arg4[%c0_17, %c0_18], %33 {strides = array<i32>} : memref<3x32xf32, #tpu.memory_space<vmem>>, vector<3x32xf32>,
    } else {
    }
    %c0 = arith.constant 0 : index
    %c0_1 = arith.constant 0 : index
    %3 = vector.load %arg4[%c0, %c0_1] : memref<3x32xf32, #tpu.memory_space<vmem>>, vector<1x32xf32>
    %4 = vector.shape_cast %3 : vector<1x32xf32> to vector<32xf32>
    %c0_2 = arith.constant 0 : index
    %c0_3 = arith.constant 0 : index
    %5 = vector.load %arg2[%c0_2, %c0_3] : memref<8x32xf32, #tpu.memory_space<vmem>>, vector<8x32xf32>
    %cst = arith.constant dense<0.000000e+00> : vector<32xf32>
    %6 = vector.multi_reduction <add>, %5, %cst [0] : vector<8x32xf32> to vector<32xf32>
    %7 = arith.addf %4, %6 : vector<32xf32>
    %c0_4 = arith.constant 0 : index
    %c0_5 = arith.constant 0 : index
    %8 = vector.load %arg4[%c0_4, %c0_5] : memref<3x32xf32, #tpu.memory_space<vmem>>, vector<1x32xf32>
    %9 = vector.shape_cast %8 : vector<1x32xf32> to vector<32xf32>
    %10 = vector.shape_cast %7 : vector<32xf32> to vector<1x32xf32>
    tpu.vector_store %arg4[%c0_4, %c0_5], %10 {strides = array<i32>} : memref<3x32xf32, #tpu.memory_space<vmem>>, vector<1x32xf32>,
    %c8_i32 = arith.constant 8 : i32
    %11 = arith.muli %arg0, %c8_i32 : i32
    %c0_6 = arith.constant 0 : index
    %12 = memref.load %arg1[%c0_6] : memref<2xi32, #tpu.memory_space<smem>>
    %c0_i32_7 = arith.constant 0 : i32
    %c7_i32 = arith.constant 7 : i32
    %13 = arith.maxsi %c0_i32_7, %12 : i32
    %14 = arith.minsi %c7_i32, %13 : i32
    %c1 = arith.constant 1 : index
    %15 = memref.load %arg1[%c1] : memref<2xi32, #tpu.memory_space<smem>>
    %c0_i32_8 = arith.constant 0 : i32
    %c7_i32_9 = arith.constant 7 : i32
    %16 = arith.maxsi %c0_i32_8, %15 : i32
    %17 = arith.minsi %c7_i32_9, %16 : i32
    %18 = arith.cmpi sge, %14, %11 : i32
    %c8_i32_10 = arith.constant 8 : i32
    %19 = arith.addi %11, %c8_i32_10 : i32
    %20 = arith.cmpi slt, %14, %19 : i32
    %21 = arith.andi %18, %20 : i1
    %22 = arith.extui %21 : i1 to i32
    %c0_i32_11 = arith.constant 0 : i32
    %23 = arith.cmpi ne, %22, %c0_i32_11 : i32
    scf.if %23 {
      %33 = arith.subi %14, %11 : i32
      %34 = arith.index_cast %33 : i32 to index
      %c0_16 = arith.constant 0 : index
      %35 = vector.load %arg2[%34, %c0_16] : memref<8x32xf32, #tpu.memory_space<vmem>>, vector<1x32xf32>
      %36 = vector.shape_cast %35 : vector<1x32xf32> to vector<32xf32>
      %c1_17 = arith.constant 1 : index
      %c0_18 = arith.constant 0 : index
      %37 = vector.load %arg4[%c1_17, %c0_18] : memref<3x32xf32, #tpu.memory_space<vmem>>, vector<1x32xf32>
      %38 = vector.shape_cast %37 : vector<1x32xf32> to vector<32xf32>
      %39 = vector.shape_cast %36 : vector<32xf32> to vector<1x32xf32>
      tpu.vector_store %arg4[%c1_17, %c0_18], %39 {strides = array<i32>} : memref<3x32xf32, #tpu.memory_space<vmem>>, vector<1x32xf32>,
    } else {
    }
    %24 = arith.cmpi sge, %17, %11 : i32
    %c8_i32_12 = arith.constant 8 : i32
    %25 = arith.addi %11, %c8_i32_12 : i32
    %26 = arith.cmpi slt, %17, %25 : i32
    %27 = arith.andi %24, %26 : i1
    %28 = arith.extui %27 : i1 to i32
    %c0_i32_13 = arith.constant 0 : i32
    %29 = arith.cmpi ne, %28, %c0_i32_13 : i32
    scf.if %29 {
      %33 = arith.subi %17, %11 : i32
      %34 = arith.index_cast %33 : i32 to index
      %c0_16 = arith.constant 0 : index
      %35 = vector.load %arg2[%34, %c0_16] : memref<8x32xf32, #tpu.memory_space<vmem>>, vector<1x32xf32>
      %36 = vector.shape_cast %35 : vector<1x32xf32> to vector<32xf32>
      %c2 = arith.constant 2 : index
      %c0_17 = arith.constant 0 : index
      %37 = vector.load %arg4[%c2, %c0_17] : memref<3x32xf32, #tpu.memory_space<vmem>>, vector<1x32xf32>
      %38 = vector.shape_cast %37 : vector<1x32xf32> to vector<32xf32>
      %39 = vector.shape_cast %36 : vector<32xf32> to vector<1x32xf32>
      tpu.vector_store %arg4[%c2, %c0_17], %39 {strides = array<i32>} : memref<3x32xf32, #tpu.memory_space<vmem>>, vector<1x32xf32>,
    } else {
    }
    %c0_i32_14 = arith.constant 0 : i32
    %30 = arith.cmpi eq, %arg0, %c0_i32_14 : i32
    %31 = arith.extui %30 : i1 to i32
    %c0_i32_15 = arith.constant 0 : i32
    %32 = arith.cmpi ne, %31, %c0_i32_15 : i32
    scf.if %32 {
      %c0_16 = arith.constant 0 : index
      %c0_17 = arith.constant 0 : index
      %33 = vector.load %arg4[%c0_16, %c0_17] : memref<3x32xf32, #tpu.memory_space<vmem>>, vector<1x32xf32>
      %34 = vector.shape_cast %33 : vector<1x32xf32> to vector<32xf32>
      %cst_18 = arith.constant 1.250000e-01 : f32
      %35 = vector.broadcast %cst_18 : f32 to vector<32xf32>
      %36 = arith.mulf %34, %35 : vector<32xf32>
      %c0_19 = arith.constant 0 : index
      %c0_20 = arith.constant 0 : index
      %37 = vector.load %arg3[%c0_19, %c0_20] : memref<1x128xf32, #tpu.memory_space<vmem>>, vector<1x32xf32>
      %38 = vector.shape_cast %37 : vector<1x32xf32> to vector<32xf32>
      %39 = vector.shape_cast %36 : vector<32xf32> to vector<1x32xf32>
      tpu.vector_store %arg3[%c0_19, %c0_20], %39 {strides = array<i32>} : memref<1x128xf32, #tpu.memory_space<vmem>>, vector<1x32xf32>,
      %c1_21 = arith.constant 1 : index
      %c0_22 = arith.constant 0 : index
      %40 = vector.load %arg4[%c1_21, %c0_22] : memref<3x32xf32, #tpu.memory_space<vmem>>, vector<1x32xf32>
      %41 = vector.shape_cast %40 : vector<1x32xf32> to vector<32xf32>
      %c0_23 = arith.constant 0 : index
      %c32 = arith.constant 32 : index
      %42 = vector.load %arg3[%c0_23, %c32] : memref<1x128xf32, #tpu.memory_space<vmem>>, vector<1x32xf32>
      %43 = vector.shape_cast %42 : vector<1x32xf32> to vector<32xf32>
      %44 = vector.shape_cast %41 : vector<32xf32> to vector<1x32xf32>
      tpu.vector_store %arg3[%c0_23, %c32], %44 {strides = array<i32>} : memref<1x128xf32, #tpu.memory_space<vmem>>, vector<1x32xf32>,
      %c2 = arith.constant 2 : index
      %c0_24 = arith.constant 0 : index
      %45 = vector.load %arg4[%c2, %c0_24] : memref<3x32xf32, #tpu.memory_space<vmem>>, vector<1x32xf32>
      %46 = vector.shape_cast %45 : vector<1x32xf32> to vector<32xf32>
      %c0_25 = arith.constant 0 : index
      %c64 = arith.constant 64 : index
      %47 = vector.load %arg3[%c0_25, %c64] : memref<1x128xf32, #tpu.memory_space<vmem>>, vector<1x32xf32>
      %48 = vector.shape_cast %47 : vector<1x32xf32> to vector<32xf32>
      %49 = vector.shape_cast %46 : vector<32xf32> to vector<1x32xf32>
      tpu.vector_store %arg3[%c0_25, %c64], %49 {strides = array<i32>} : memref<1x128xf32, #tpu.memory_space<vmem>>, vector<1x32xf32>,
      %cst_26 = arith.constant 0.000000e+00 : f32
      %50 = vector.broadcast %cst_26 : f32 to vector<32xf32>
      %c0_27 = arith.constant 0 : index
      %c96 = arith.constant 96 : index
      %51 = vector.load %arg3[%c0_27, %c96] : memref<1x128xf32, #tpu.memory_space<vmem>>, vector<1x32xf32>
      %52 = vector.shape_cast %51 : vector<1x32xf32> to vector<32xf32>
      %53 = vector.shape_cast %50 : vector<32xf32> to vector<1x32xf32>
      tpu.vector_store %arg3[%c0_27, %c96], %53 {strides = array<i32>} : memref<1x128xf32, #tpu.memory_space<vmem>>, vector<1x32xf32>,
    } else {
    }
    return
  }
  func.func @transform_0(%arg0: i32, %arg1: memref<2xi32, #tpu.memory_space<smem>>) -> (i32, i32) {
    %c0_i32 = arith.constant 0 : i32
    %c0_i32_0 = arith.constant 0 : i32
    return %arg0, %c0_i32 : i32, i32
  }
  func.func @transform_1(%arg0: i32, %arg1: memref<2xi32, #tpu.memory_space<smem>>) -> (i32, i32) {
    %c0_i32 = arith.constant 0 : i32
    %c0_i32_0 = arith.constant 0 : i32
    %c0_i32_1 = arith.constant 0 : i32
    return %c0_i32, %c0_i32_0 : i32, i32
  }
}

</mosaic_0001>

<bundles_post_ra>
// kernel: tpu_custom_call.1
= control target key start
LH: loop header
LB: loop body
LE: loop exit
PB: predicated region body
PF: predicated region fallthrough
CT: control target
= control target key end

     0   :  { %s258_s0 = inlined_call_operand.hbm [shape: s32[2], index: 0, kind: input, shape index: {}]   ;;  %s259_s1 = inlined_call_operand.hbm [shape: f32[8,32], index: 1, kind: input, shape index: {}]   ;;  %s260_s2 = inlined_call_operand.hbm [shape: f32[1,128], index: 2, kind: output, shape index: {}]  }
   0x1   :  { %s137_s11 = scalar_lea.hbm %s258_s0, 16 }
   0x2   :  { %p138_p0 = scmp.ne.s32.totalorder %s258_s0, %s137_s11  ;;  %p141_p1 = scmp.lt.u32.totalorder %s137_s11, %s258_s0 }
   0x4   :  { %p143_p2 = pnand %p141_p1, %p138_p0 }
   0x6   :  { %146 = shalt.err (!%p143_p2)  }
   0x7   :  { %s197_s16 = smov [#allocation4]  }
   0x8   :  { %8 = dma.hbm_to_smem %s258_s0, 16, %s197_s16, [#allocation3] }
   0x9   :  { %191 = dma.done.wait [#allocation3], 16 }
   0xa   :  { %192 = vsyncadd [#allocation3], 4294967280 }
   0xb   :  { %10 = sfence }
   0xc   :  { %11 = vsyncpa [#allocation6], 0 }
   0xd   :  { %12 = vsyncpa [#allocation7], 0  ;;  %s198_s19 = smov [#allocation5]   ;;  %s147_s23 = scalar_lea.hbm %s259_s1, 128 }
   0xe   :  { %s19_s20 = sshll.u32 %s198_s19, 4  ;;  %p148_p3 = scmp.ne.s32.totalorder %s259_s1, %s147_s23  ;;  %s20_s20 = int_to_ptr.vmem [resolvable:$true] %s19_s20 }
   0xf   :  { %p151_p4 = scmp.lt.u32.totalorder %s147_s23, %s259_s1 }
  0x11   :  { %p153_p5 = pnand %p151_p4, %p148_p3 }
  0x13   :  { %156 = shalt.err (!%p153_p5)
}
  0x14   :  { %s157_s0 = scalar_lea.vmem %s20_s20, 128  ;;  %p162_p7 = scmp.lt.s32.totalorder %s20_s20, %s20_s20 }
  0x15   :  { %p158_p6 = scmp.ne.s32.totalorder %s20_s20, %s157_s0  ;;  %p163_p8 = scmp.lt.s32.totalorder %s157_s0, %s157_s0 }
  0x17   :  { %p164_p9 = por %p163_p8, %p162_p7 }
  0x19   :  { %p165_p10 = pnand %p164_p9, %p158_p6 }
  0x1b   :  { %168 = shalt.err (!%p165_p10)
}
  0x1c   :  { %22 = dma.hbm_to_vmem [thread:$0]  %s259_s1, 128, %s20_s20, [#allocation6]  }
  0x1d   :  { %193 = dma.done.wait [#allocation6], 128  }
  0x1e   :  { %194 = vsyncadd [#allocation6], 4294967168  ;;  %vm30_vm0 = vcmask 256000   ;;  %s46_s30 = sld [smem:[#allocation4]]  ;;  %s121_s3 = sld [smem:[#allocation4 + $0x1]]  ;;  %v199_v0 = vmov 0.0  }
  0x1f   :  { %31 = vst.msk [vmem:[#allocation2] sm:$0x7] %vm30_vm0, %v199_v0  ;;  %vm34_vm1 = vcmask 261120   ;;  %v33_v1 = vld [vmem:[#allocation5] sm:$0xff]  ;;  %vm43_vm2 = vcmask 253952  }
  0x20   :  { %v35_v2 = vsel %vm34_vm1, %v33_v1, 0.0 }
  0x21   :  { %v36_v3 = vrot.slane %v35_v2, 4 }
  0x23   :  { %v37_v4 = vadd.f32 %v36_v3, %v35_v2 }
  0x24   :  { %p47_p11 = scmp.gt.s32.totalorder %s46_s30, 0  ;;  %p116_p12 = scmp.lt.s32.totalorder %s46_s30, 7 }
  0x25   :  { %p52_p13 = scmp.gt.s32.totalorder %s121_s3, 0  ;;  %p122_p0 = scmp.lt.s32.totalorder %s121_s3, 7  ;;  %v38_v5 = vrot.slane %v37_v4, 2 }
  0x26   :  { %s262_s30 = smov (!%p47_p11, %s46_s30), 0  ;;  %v32_v8 = vld [vmem:[#allocation2] sm:$0x1] }
  0x27   :  { %s264_s3 = smov (!%p52_p13, %s121_s3), 0  ;;  %s266_s30 = smov (!%p116_p12, %s262_s30), 7  ;;  %v39_v6 = vadd.f32 %v38_v5, %v37_v4 }
  0x28   :  { %s268_s3 = smov (!%p122_p0, %s264_s3), 7  ;;  %p56_p1 = scmp.ge.s32.totalorder %s266_s30, 0 }
  0x29   :  { %p58_p2 = scmp.lt.s32.totalorder %s266_s30, 8  ;;  %v40_v7 = vrot.slane %v39_v6, 1 }
  0x2b   :  { %p59_p3 = pnand %p58_p2, %p56_p1  ;;  %v41_v9 = vadd.f32 %v40_v7, %v39_v6 }
  0x2c   :  { %s64_s1 = scalar_lea.vmem (!%p59_p3), [#allocation5], %s266_s30 }
  0x2d   :  { %v42_v10 = vadd.f32 %v41_v9, %v32_v8  ;;  %62 = sbr.rel (%p59_p3) target bundleno = 52 (0x34), region = 17  ;;  %v65_v11 = vld [vmem:[%s64_s1] sm:$0x1] (!%p59_p3) }
  0x2e   :  { %66 = vst.msk [vmem:[#allocation2 + $0x1] sm:$0x1] (!%p59_p3), %vm43_vm2, %v65_v11 }
  0x2f   :  { %44 = vst.msk [vmem:[#allocation2] sm:$0x1] %vm43_vm2, %v42_v10 }
  0x34 PF:  { %p67_p4 = scmp.ge.s32.totalorder %s268_s3, 0  ;;  %p68_p5 = scmp.lt.s32.totalorder %s268_s3, 8 }
  0x36   :  { %p69_p6 = pnand %p68_p5, %p67_p4 }
  0x37   :  { %s74_s4 = scalar_lea.vmem (!%p69_p6), [#allocation5], %s268_s3 }
  0x38   :  { %72 = sbr.rel (%p69_p6) target bundleno = 63 (0x3f), region = 21  ;;  %v75_v12 = vld [vmem:[%s74_s4] sm:$0x1] (!%p69_p6) }
  0x39   :  { %76 = vst.msk [vmem:[#allocation2 + $0x2] sm:$0x1] (!%p69_p6), %vm43_vm2, %v75_v12 }
  0x3f PF:  { %v83_v13 = vld [vmem:[#allocation2 + $0x1] sm:$0x1]  ;;  %s200_s5 = smov 32   ;;  %v80_v14 = vld [vmem:[#allocation2] sm:$0x1]  ;;  %s201_s6 = smov 64  }
  0x40   :  { %85 = vrot.lane.b32.xlu0 %v83_v13, %s200_s5  ;;  %v90_v15 = vld [vmem:[#allocation2 + $0x2] sm:$0x1]  ;;  %v81_v16 = vmul.f32 0.125, %v80_v14  ;;  %vm88_vm3 = vcmask 516352   ;;  %s202_s7 = smov [#allocation8]   ;;  %vm95_vm4 = vcmask 778752  }
  0x41   :  { %s105_s8 = sshll.u32 %s202_s7, 4  ;;  %vm97_vm5 = vcmask 1041152   ;;  %s106_s8 = int_to_ptr.vmem [resolvable:$true] %s105_s8 }
  0x42   :  { %82 = vst.msk [vmem:[#allocation8] sm:$0x1] %vm43_vm2, %v81_v16  ;;  %s169_s9 = scalar_lea.vmem %s106_s8, 16  ;;  %s173_s10 = scalar_lea.vmem %s106_s8, 32 }
  0x43   :  { %p170_p7 = scmp.ne.s32.totalorder %s106_s8, %s169_s9  ;;  %p174_p8 = scmp.lt.s32.totalorder %s106_s8, %s106_s8 }
  0x44   :  { %92 = vrot.lane.b32.xlu0 %v90_v15, %s201_s6  ;;  %p175_p9 = scmp.lt.s32.totalorder %s173_s10, %s169_s9 }
  0x46   :  { %p176_p10 = por %p175_p9, %p174_p8 }
  0x48   :  { %p177_p11 = pnand %p176_p10, %p170_p7 }
  0xb2   :  { %v86_v17 = vpop.permute.xlu0 %85 }
  0xb3   :  { %89 = vst.msk [vmem:[#allocation8] sm:$0x1] %vm88_vm3, %v86_v17 }
  0xb6   :  { %v93_v18 = vpop.permute.xlu0 %92 }
  0xb7   :  { %96 = vst.msk [vmem:[#allocation8] sm:$0x1] %vm95_vm4, %v93_v18 }
  0xb8   :  { %98 = vst.msk [vmem:[#allocation8] sm:$0x1] %vm97_vm5, %v199_v0 }
  0xb9   :  { %180 = shalt.err (!%p177_p11)
}
  0xba   :  { %s181_s13 = scalar_lea.hbm %s260_s2, 16 }
  0xbb   :  { %p182_p12 = scmp.ne.s32.totalorder %s260_s2, %s181_s13  ;;  %p185_p13 = scmp.lt.u32.totalorder %s181_s13, %s260_s2 }
  0xbd   :  { %p187_p0 = pnand %p185_p13, %p182_p12 }
  0xbf   :  { %190 = shalt.err (!%p187_p0)
}
  0xc0   :  { %108 = dma.vmem_to_hbm [thread:$0]  %s106_s8, 16, %s260_s2, [#allocation7]  }
  0xc1   :  { %195 = dma.done.wait [#allocation7], 16  }
  0xc2   :  { %196 = vsyncadd [#allocation7], 4294967280 }
  0xc3   :  { %112 = vsyncpa [#allocation6], 1 }
  0xc4   :  { %113 = vsyncpa [#allocation7], 1 }

</bundles_post_ra>
